<compile_context>
chip_gen: v7x
topology: tpu7x:2x2x1
jax: 0.10.0
libtpu: 0.0.40
codegen_flags: <defaults>
</compile_context>

<pallas_src>
import functools

import jax
import jax.numpy as jnp
from jax.experimental import pallas as pl
from jax.experimental.pallas import tpu as pltpu


def _temporal_block_kernel(x_ref, w1_ref, b1_ref, w2_ref, b2_ref,
                           wds_ref, bds_ref, out_ref, xpad_ref, hpad_ref,
                           *, kernel_size, dilation, padding):
    """One batch block per grid step, NCL layout, batch folded into lanes.

    x_ref    : (nb, C_in, L)            bf16 activations
    w1_ref   : (K, C_out, C_in)         bf16 (per-tap weights)
    b1_ref   : (C_out, 1)               f32
    w2_ref   : (K, C_out, C_out)        bf16
    b2_ref   : (C_out, 1)               f32
    wds_ref  : (C_out, C_in)            bf16 (1x1 downsample conv)
    bds_ref  : (C_out, 1)               f32
    out_ref  : (nb, C_out, L)           f32
    xpad_ref : (C_in,  nb*(pad+L))      bf16 VMEM scratch (causal pad per segment)
    hpad_ref : (C_out, nb*(pad+L))      bf16 VMEM scratch
    """
    nb, c_in, L = x_ref.shape
    c_out = out_ref.shape[1]
    K, d, p = kernel_size, dilation, padding
    T = p + L                    # segment stride in the padded scratch
    W = nb * T                   # padded scratch width
    Wv = W - p                   # valid-conv output width (all segments)

    # ---- stage x into the causally padded scratch ---------------------------
    # Pad columns are re-zeroed every step: the scratch persists across grid
    # steps (and each TensorCore owns its own copy under core-parallel split),
    # so correctness must not depend on which program_id runs first on a core.
    if p > 0:
        for b in range(nb):
            xpad_ref[:, b * T:b * T + p] = jnp.zeros((c_in, p), xpad_ref.dtype)
    for b in range(nb):
        xpad_ref[:, b * T + p:(b + 1) * T] = x_ref[b]

    # ---- conv1: K accumulating MXU matmuls over contiguous lane slices ------
    acc1 = jnp.dot(w1_ref[0], xpad_ref[:, 0:Wv],
                   preferred_element_type=jnp.float32)
    for k in range(1, K):
        acc1 += jnp.dot(w1_ref[k], xpad_ref[:, k * d:k * d + Wv],
                        preferred_element_type=jnp.float32)
    h1 = jnp.maximum(acc1 + b1_ref[...], 0.0)          # ReLU (dropout = id)

    # ---- stage h1 into the second padded scratch -----------------------------
    # conv1's cross-segment junk columns land exactly on the pad columns of the
    # following segment, so re-zeroing the pad columns also scrubs the junk.
    hpad_ref[:, p:] = h1.astype(hpad_ref.dtype)
    if p > 0:
        for b in range(nb):
            hpad_ref[:, b * T:b * T + p] = jnp.zeros((c_out, p), hpad_ref.dtype)

    # ---- conv2 ----------------------------------------------------------------
    acc2 = jnp.dot(w2_ref[0], hpad_ref[:, 0:Wv],
                   preferred_element_type=jnp.float32)
    for k in range(1, K):
        acc2 += jnp.dot(w2_ref[k], hpad_ref[:, k * d:k * d + Wv],
                        preferred_element_type=jnp.float32)
    h2 = jnp.maximum(acc2 + b2_ref[...], 0.0)

    # ---- residual (1x1 conv downsample) + final ReLU --------------------------
    # xpad[:, p:] has batch-b data at columns [b*T, b*T+L) -> aligned with h2.
    res = jnp.dot(wds_ref[...], xpad_ref[:, p:],
                  preferred_element_type=jnp.float32) + bds_ref[...]
    y = jnp.maximum(h2 + res, 0.0)

    for b in range(nb):                                  # static unroll
        out_ref[b, :, :] = y[:, b * T:b * T + L].astype(out_ref.dtype)


def _pick_batch_block(n, seg_lanes, cap=8, max_lanes=4096):
    """Largest divisor of n (<= cap) that leaves >= 2 grid steps and keeps the
    padded scratch lane width reasonable."""
    best = 1
    for nb in range(2, min(cap, max(1, n // 2)) + 1):
        if n % nb == 0 and nb * seg_lanes <= max_lanes:
            best = nb
    return best


def temporal_block_forward(x_ncl, w1, b1, w2, b2, wds, bds,
                           kernel_size, dilation, padding,
                           compute_dtype=jnp.bfloat16):
    """x_ncl: (N, C_in, L) float32 (PyTorch layout).  Returns (N, C_out, L) f32."""
    N, c_in, L = x_ncl.shape
    c_out = w1.shape[0]
    K = kernel_size
    out_dtype = jnp.float32

    nb = _pick_batch_block(N, padding + L)

    # bf16 activations / weights at the boundary; f32 accumulation in-kernel.
    x_c = x_ncl.astype(compute_dtype)
    # Per-tap weight layout: (C_out, C_in, K) -> (K, C_out, C_in).
    w1_k = jnp.transpose(w1, (2, 0, 1)).astype(compute_dtype)
    w2_k = jnp.transpose(w2, (2, 0, 1)).astype(compute_dtype)
    wds_m = wds[:, :, 0].astype(compute_dtype)               # (C_out, C_in)
    b1_r = b1.reshape(c_out, 1).astype(jnp.float32)
    b2_r = b2.reshape(c_out, 1).astype(jnp.float32)
    bds_r = bds.reshape(c_out, 1).astype(jnp.float32)

    kernel = functools.partial(
        _temporal_block_kernel,
        kernel_size=K, dilation=dilation, padding=padding)

    padw = nb * (padding + L)

    out = pl.pallas_call(
        kernel,
        out_shape=jax.ShapeDtypeStruct((N, c_out, L), out_dtype),
        grid_spec=pltpu.PrefetchScalarGridSpec(
            num_scalar_prefetch=0,
            grid=(N // nb,),
            in_specs=[
                pl.BlockSpec((nb, c_in, L), lambda n: (n, 0, 0)),
                pl.BlockSpec((K, c_out, c_in), lambda n: (0, 0, 0)),
                pl.BlockSpec((c_out, 1), lambda n: (0, 0)),
                pl.BlockSpec((K, c_out, c_out), lambda n: (0, 0, 0)),
                pl.BlockSpec((c_out, 1), lambda n: (0, 0)),
                pl.BlockSpec((c_out, c_in), lambda n: (0, 0)),
                pl.BlockSpec((c_out, 1), lambda n: (0, 0)),
            ],
            out_specs=pl.BlockSpec((nb, c_out, L), lambda n: (n, 0, 0)),
            scratch_shapes=[
                pltpu.VMEM((c_in, padw), compute_dtype),
                pltpu.VMEM((c_out, padw), compute_dtype),
            ],
        ),
        compiler_params=pltpu.CompilerParams(
            dimension_semantics=("parallel",),
            vmem_limit_bytes=32 * 1024 * 1024,   # safe on v5e/v6e/v7x
        ),
    )(x_c, w1_k, b1_r, w2_k, b2_r, wds_m, bds_r)

    return out


# ----------------------------- pure-JAX reference -----------------------------
def _conv1d_ref(x, w, b, padding, dilation):
    # x: (N, C_in, L), w: (C_out, C_in, K)   (PyTorch Conv1d semantics)
    y = jax.lax.conv_general_dilated(
        x, w, window_strides=(1,), padding=[(padding, padding)],
        rhs_dilation=(dilation,), dimension_numbers=("NCH", "OIH", "NCH"),
    )
    return y + b[None, :, None]


def _temporal_block_ref(x, w1, b1, w2, b2, wds, bds, padding, dilation):
    h = _conv1d_ref(x, w1, b1, padding, dilation)
    h = h[:, :, :-padding] if padding > 0 else h        # Chomp1d
    h = jnp.maximum(h, 0.0)                             # ReLU (dropout=identity)
    h = _conv1d_ref(h, w2, b2, padding, dilation)
    h = h[:, :, :-padding] if padding > 0 else h
    h = jnp.maximum(h, 0.0)
    res = _conv1d_ref(x, wds, bds, padding=0, dilation=1)
    return jnp.maximum(h + res, 0.0)


def _weight_norm_effective(v, g):
    # weight_norm(..., dim=None): w = g * v / ||v||_F  (g is a scalar)
    return g * v / jnp.sqrt(jnp.sum(v * v))


if __name__ == "__main__":
    # small shapes consistent with TemporalBlock(n_inputs=4, n_outputs=8,
    # kernel_size=3, stride=1, dilation=2, padding=(3-1)*2=4)
    N, C_IN, C_OUT, L = 2, 4, 8, 16
    K, STRIDE, DILATION = 3, 1, 2
    PADDING = (K - 1) * DILATION
    assert STRIDE == 1

    key = jax.random.PRNGKey(0)
    ks = jax.random.split(key, 8)

    x = jax.random.normal(ks[0], (N, C_IN, L), jnp.float32)

    # conv1 / conv2 parameters (weight_norm reparameterization, dim=None)
    v1 = 0.01 * jax.random.normal(ks[1], (C_OUT, C_IN, K), jnp.float32)
    g1 = jnp.sqrt(jnp.sum(v1 * v1))          # g init = ||v||  ->  w_eff == v
    w1 = _weight_norm_effective(v1, g1)
    b1 = 0.1 * jax.random.normal(ks[2], (C_OUT,), jnp.float32)

    v2 = 0.01 * jax.random.normal(ks[3], (C_OUT, C_OUT, K), jnp.float32)
    g2 = jnp.sqrt(jnp.sum(v2 * v2))
    w2 = _weight_norm_effective(v2, g2)
    b2 = 0.1 * jax.random.normal(ks[4], (C_OUT,), jnp.float32)

    # downsample 1x1 conv (n_inputs != n_outputs)
    wds = 0.01 * jax.random.normal(ks[5], (C_OUT, C_IN, 1), jnp.float32)
    bds = 0.1 * jax.random.normal(ks[6], (C_OUT,), jnp.float32)

    out = temporal_block_forward(x, w1, b1, w2, b2, wds, bds,
                                 K, DILATION, PADDING)
    out = jax.block_until_ready(out)

    ref = _temporal_block_ref(x, w1, b1, w2, b2, wds, bds, PADDING, DILATION)
    assert out.shape == (N, C_OUT, L), out.shape
    # bf16 activations/weights in the kernel vs f32 reference -> loose tolerance
    assert jnp.allclose(out, ref, atol=1e-2, rtol=1e-2), \
        f"max abs err = {jnp.max(jnp.abs(out - ref))}"

    print("KERNEL_OK")
</pallas_src>

<mosaic_0001>
module attributes {stable_mosaic.version = 11 : i64} {
  func.func @_temporal_block_kernel(%arg0: i32, %arg1: memref<1x4x16xbf16, #tpu.memory_space<vmem>>, %arg2: memref<3x8x4xbf16, #tpu.memory_space<vmem>>, %arg3: memref<8x1xf32, #tpu.memory_space<vmem>>, %arg4: memref<3x8x8xbf16, #tpu.memory_space<vmem>>, %arg5: memref<8x1xf32, #tpu.memory_space<vmem>>, %arg6: memref<8x4xbf16, #tpu.memory_space<vmem>>, %arg7: memref<8x1xf32, #tpu.memory_space<vmem>>, %arg8: memref<1x8x16xf32, #tpu.memory_space<vmem>>, %arg9: memref<4x20xbf16, #tpu.memory_space<vmem>>, %arg10: memref<8x20xbf16, #tpu.memory_space<vmem>>) attributes {dimension_semantics = [#tpu.dimension_semantics<parallel>], iteration_bounds = array<i64: 2>, scalar_prefetch = 0 : i64, scratch_operands = 2 : i64, tpu.core_type = #tpu.core_type<tc>, window_params = [{transform_indices = @transform_0, window_bounds = array<i64: 1, 4, 16>}, {pipeline_mode = #tpu.pipeline_mode<synchronous>, transform_indices = @transform_1, window_bounds = array<i64: 3, 8, 4>}, {pipeline_mode = #tpu.pipeline_mode<synchronous>, transform_indices = @transform_2, window_bounds = array<i64: 8, 1>}, {pipeline_mode = #tpu.pipeline_mode<synchronous>, transform_indices = @transform_3, window_bounds = array<i64: 3, 8, 8>}, {pipeline_mode = #tpu.pipeline_mode<synchronous>, transform_indices = @transform_4, window_bounds = array<i64: 8, 1>}, {pipeline_mode = #tpu.pipeline_mode<synchronous>, transform_indices = @transform_5, window_bounds = array<i64: 8, 4>}, {pipeline_mode = #tpu.pipeline_mode<synchronous>, transform_indices = @transform_6, window_bounds = array<i64: 8, 1>}, {transform_indices = @transform_7, window_bounds = array<i64: 1, 8, 16>}]} {
    %cst = arith.constant 0.000000e+00 : bf16
    %0 = vector.broadcast %cst : bf16 to vector<4x4xbf16>
    %c0 = arith.constant 0 : index
    %c0_0 = arith.constant 0 : index
    %1 = vector.load %arg9[%c0, %c0_0] : memref<4x20xbf16, #tpu.memory_space<vmem>>, vector<4x4xbf16>
    tpu.vector_store %arg9[%c0, %c0_0], %0 {strides = array<i32>} : memref<4x20xbf16, #tpu.memory_space<vmem>>, vector<4x4xbf16>,
    %c0_1 = arith.constant 0 : index
    %c0_2 = arith.constant 0 : index
    %c0_3 = arith.constant 0 : index
    %2 = vector.load %arg1[%c0_1, %c0_2, %c0_3] : memref<1x4x16xbf16, #tpu.memory_space<vmem>>, vector<1x4x16xbf16>
    %3 = vector.shape_cast %2 : vector<1x4x16xbf16> to vector<4x16xbf16>
    %c0_4 = arith.constant 0 : index
    %c4 = arith.constant 4 : index
    %4 = vector.load %arg9[%c0_4, %c4] : memref<4x20xbf16, #tpu.memory_space<vmem>>, vector<4x16xbf16>
    tpu.vector_store %arg9[%c0_4, %c4], %3 {strides = array<i32>} : memref<4x20xbf16, #tpu.memory_space<vmem>>, vector<4x16xbf16>,
    %c0_5 = arith.constant 0 : index
    %c0_6 = arith.constant 0 : index
    %c0_7 = arith.constant 0 : index
    %5 = vector.load %arg2[%c0_5, %c0_6, %c0_7] : memref<3x8x4xbf16, #tpu.memory_space<vmem>>, vector<1x8x4xbf16>
    %6 = vector.shape_cast %5 : vector<1x8x4xbf16> to vector<8x4xbf16>
    %c0_8 = arith.constant 0 : index
    %c0_9 = arith.constant 0 : index
    %7 = vector.load %arg9[%c0_8, %c0_9] : memref<4x20xbf16, #tpu.memory_space<vmem>>, vector<4x16xbf16>
    %cst_10 = arith.constant dense<0.000000e+00> : vector<8x16xf32>
    %8 = tpu.matmul %6, %7, %cst_10 {dimension_numbers = #tpu.dot_dimension_numbers<[1], [0], [0], [1], [0, 0, 1, 1], [], []>} : vector<8x4xbf16>, vector<4x16xbf16>, vector<8x16xf32> -> vector<8x16xf32>
    %c1 = arith.constant 1 : index
    %c0_11 = arith.constant 0 : index
    %c0_12 = arith.constant 0 : index
    %9 = vector.load %arg2[%c1, %c0_11, %c0_12] : memref<3x8x4xbf16, #tpu.memory_space<vmem>>, vector<1x8x4xbf16>
    %10 = vector.shape_cast %9 : vector<1x8x4xbf16> to vector<8x4xbf16>
    %c0_13 = arith.constant 0 : index
    %c2 = arith.constant 2 : index
    %11 = vector.load %arg9[%c0_13, %c2] : memref<4x20xbf16, #tpu.memory_space<vmem>>, vector<4x16xbf16>
    %cst_14 = arith.constant dense<0.000000e+00> : vector<8x16xf32>
    %12 = tpu.matmul %10, %11, %cst_14 {dimension_numbers = #tpu.dot_dimension_numbers<[1], [0], [0], [1], [0, 0, 1, 1], [], []>} : vector<8x4xbf16>, vector<4x16xbf16>, vector<8x16xf32> -> vector<8x16xf32>
    %13 = arith.addf %8, %12 : vector<8x16xf32>
    %c2_15 = arith.constant 2 : index
    %c0_16 = arith.constant 0 : index
    %c0_17 = arith.constant 0 : index
    %14 = vector.load %arg2[%c2_15, %c0_16, %c0_17] : memref<3x8x4xbf16, #tpu.memory_space<vmem>>, vector<1x8x4xbf16>
    %15 = vector.shape_cast %14 : vector<1x8x4xbf16> to vector<8x4xbf16>
    %c0_18 = arith.constant 0 : index
    %c4_19 = arith.constant 4 : index
    %16 = vector.load %arg9[%c0_18, %c4_19] : memref<4x20xbf16, #tpu.memory_space<vmem>>, vector<4x16xbf16>
    %cst_20 = arith.constant dense<0.000000e+00> : vector<8x16xf32>
    %17 = tpu.matmul %15, %16, %cst_20 {dimension_numbers = #tpu.dot_dimension_numbers<[1], [0], [0], [1], [0, 0, 1, 1], [], []>} : vector<8x4xbf16>, vector<4x16xbf16>, vector<8x16xf32> -> vector<8x16xf32>
    %18 = arith.addf %13, %17 : vector<8x16xf32>
    %c0_21 = arith.constant 0 : index
    %c0_22 = arith.constant 0 : index
    %19 = vector.load %arg3[%c0_21, %c0_22] : memref<8x1xf32, #tpu.memory_space<vmem>>, vector<8x1xf32>
    %20 = vector.broadcast %19 : vector<8x1xf32> to vector<8x16xf32>
    %21 = arith.addf %18, %20 : vector<8x16xf32>
    %cst_23 = arith.constant 0.000000e+00 : f32
    %22 = vector.broadcast %cst_23 : f32 to vector<8x16xf32>
    %23 = arith.maximumf %21, %22 : vector<8x16xf32>
    %24 = arith.truncf %23 : vector<8x16xf32> to vector<8x16xbf16>
    %c0_24 = arith.constant 0 : index
    %c4_25 = arith.constant 4 : index
    %25 = vector.load %arg10[%c0_24, %c4_25] : memref<8x20xbf16, #tpu.memory_space<vmem>>, vector<8x16xbf16>
    tpu.vector_store %arg10[%c0_24, %c4_25], %24 {strides = array<i32>} : memref<8x20xbf16, #tpu.memory_space<vmem>>, vector<8x16xbf16>,
    %cst_26 = arith.constant 0.000000e+00 : bf16
    %26 = vector.broadcast %cst_26 : bf16 to vector<8x4xbf16>
    %c0_27 = arith.constant 0 : index
    %c0_28 = arith.constant 0 : index
    %27 = vector.load %arg10[%c0_27, %c0_28] : memref<8x20xbf16, #tpu.memory_space<vmem>>, vector<8x4xbf16>
    tpu.vector_store %arg10[%c0_27, %c0_28], %26 {strides = array<i32>} : memref<8x20xbf16, #tpu.memory_space<vmem>>, vector<8x4xbf16>,
    %c0_29 = arith.constant 0 : index
    %c0_30 = arith.constant 0 : index
    %c0_31 = arith.constant 0 : index
    %28 = vector.load %arg4[%c0_29, %c0_30, %c0_31] : memref<3x8x8xbf16, #tpu.memory_space<vmem>>, vector<1x8x8xbf16>
    %29 = vector.shape_cast %28 : vector<1x8x8xbf16> to vector<8x8xbf16>
    %c0_32 = arith.constant 0 : index
    %c0_33 = arith.constant 0 : index
    %30 = vector.load %arg10[%c0_32, %c0_33] : memref<8x20xbf16, #tpu.memory_space<vmem>>, vector<8x16xbf16>
    %cst_34 = arith.constant dense<0.000000e+00> : vector<8x16xf32>
    %31 = tpu.matmul %29, %30, %cst_34 {dimension_numbers = #tpu.dot_dimension_numbers<[1], [0], [0], [1], [0, 0, 1, 1], [], []>} : vector<8x8xbf16>, vector<8x16xbf16>, vector<8x16xf32> -> vector<8x16xf32>
    %c1_35 = arith.constant 1 : index
    %c0_36 = arith.constant 0 : index
    %c0_37 = arith.constant 0 : index
    %32 = vector.load %arg4[%c1_35, %c0_36, %c0_37] : memref<3x8x8xbf16, #tpu.memory_space<vmem>>, vector<1x8x8xbf16>
    %33 = vector.shape_cast %32 : vector<1x8x8xbf16> to vector<8x8xbf16>
    %c0_38 = arith.constant 0 : index
    %c2_39 = arith.constant 2 : index
    %34 = vector.load %arg10[%c0_38, %c2_39] : memref<8x20xbf16, #tpu.memory_space<vmem>>, vector<8x16xbf16>
    %cst_40 = arith.constant dense<0.000000e+00> : vector<8x16xf32>
    %35 = tpu.matmul %33, %34, %cst_40 {dimension_numbers = #tpu.dot_dimension_numbers<[1], [0], [0], [1], [0, 0, 1, 1], [], []>} : vector<8x8xbf16>, vector<8x16xbf16>, vector<8x16xf32> -> vector<8x16xf32>
    %36 = arith.addf %31, %35 : vector<8x16xf32>
    %c2_41 = arith.constant 2 : index
    %c0_42 = arith.constant 0 : index
    %c0_43 = arith.constant 0 : index
    %37 = vector.load %arg4[%c2_41, %c0_42, %c0_43] : memref<3x8x8xbf16, #tpu.memory_space<vmem>>, vector<1x8x8xbf16>
    %38 = vector.shape_cast %37 : vector<1x8x8xbf16> to vector<8x8xbf16>
    %c0_44 = arith.constant 0 : index
    %c4_45 = arith.constant 4 : index
    %39 = vector.load %arg10[%c0_44, %c4_45] : memref<8x20xbf16, #tpu.memory_space<vmem>>, vector<8x16xbf16>
    %cst_46 = arith.constant dense<0.000000e+00> : vector<8x16xf32>
    %40 = tpu.matmul %38, %39, %cst_46 {dimension_numbers = #tpu.dot_dimension_numbers<[1], [0], [0], [1], [0, 0, 1, 1], [], []>} : vector<8x8xbf16>, vector<8x16xbf16>, vector<8x16xf32> -> vector<8x16xf32>
    %41 = arith.addf %36, %40 : vector<8x16xf32>
    %c0_47 = arith.constant 0 : index
    %c0_48 = arith.constant 0 : index
    %42 = vector.load %arg5[%c0_47, %c0_48] : memref<8x1xf32, #tpu.memory_space<vmem>>, vector<8x1xf32>
    %43 = vector.broadcast %42 : vector<8x1xf32> to vector<8x16xf32>
    %44 = arith.addf %41, %43 : vector<8x16xf32>
    %cst_49 = arith.constant 0.000000e+00 : f32
    %45 = vector.broadcast %cst_49 : f32 to vector<8x16xf32>
    %46 = arith.maximumf %44, %45 : vector<8x16xf32>
    %c0_50 = arith.constant 0 : index
    %c0_51 = arith.constant 0 : index
    %47 = vector.load %arg6[%c0_50, %c0_51] : memref<8x4xbf16, #tpu.memory_space<vmem>>, vector<8x4xbf16>
    %c0_52 = arith.constant 0 : index
    %c4_53 = arith.constant 4 : index
    %48 = vector.load %arg9[%c0_52, %c4_53] : memref<4x20xbf16, #tpu.memory_space<vmem>>, vector<4x16xbf16>
    %cst_54 = arith.constant dense<0.000000e+00> : vector<8x16xf32>
    %49 = tpu.matmul %47, %48, %cst_54 {dimension_numbers = #tpu.dot_dimension_numbers<[1], [0], [0], [1], [0, 0, 1, 1], [], []>} : vector<8x4xbf16>, vector<4x16xbf16>, vector<8x16xf32> -> vector<8x16xf32>
    %c0_55 = arith.constant 0 : index
    %c0_56 = arith.constant 0 : index
    %50 = vector.load %arg7[%c0_55, %c0_56] : memref<8x1xf32, #tpu.memory_space<vmem>>, vector<8x1xf32>
    %51 = vector.broadcast %50 : vector<8x1xf32> to vector<8x16xf32>
    %52 = arith.addf %49, %51 : vector<8x16xf32>
    %53 = arith.addf %46, %52 : vector<8x16xf32>
    %cst_57 = arith.constant 0.000000e+00 : f32
    %54 = vector.broadcast %cst_57 : f32 to vector<8x16xf32>
    %55 = arith.maximumf %53, %54 : vector<8x16xf32>
    %c0_58 = arith.constant 0 : index
    %c0_59 = arith.constant 0 : index
    %c0_60 = arith.constant 0 : index
    %56 = vector.load %arg8[%c0_58, %c0_59, %c0_60] : memref<1x8x16xf32, #tpu.memory_space<vmem>>, vector<1x8x16xf32>
    %57 = vector.shape_cast %56 : vector<1x8x16xf32> to vector<8x16xf32>
    %58 = vector.shape_cast %55 : vector<8x16xf32> to vector<1x8x16xf32>
    tpu.vector_store %arg8[%c0_58, %c0_59, %c0_60], %58 {strides = array<i32>} : memref<1x8x16xf32, #tpu.memory_space<vmem>>, vector<1x8x16xf32>,
    return
  }
  func.func @transform_0(%arg0: i32) -> (i32, i32, i32) {
    %c0_i32 = arith.constant 0 : i32
    %c0_i32_0 = arith.constant 0 : i32
    %c0_i32_1 = arith.constant 0 : i32
    return %arg0, %c0_i32, %c0_i32_0 : i32, i32, i32
  }
  func.func @transform_1(%arg0: i32) -> (i32, i32, i32) {
    %c0_i32 = arith.constant 0 : i32
    %c0_i32_0 = arith.constant 0 : i32
    %c0_i32_1 = arith.constant 0 : i32
    %c0_i32_2 = arith.constant 0 : i32
    return %c0_i32, %c0_i32_0, %c0_i32_1 : i32, i32, i32
  }
  func.func @transform_2(%arg0: i32) -> (i32, i32) {
    %c0_i32 = arith.constant 0 : i32
    %c0_i32_0 = arith.constant 0 : i32
    %c0_i32_1 = arith.constant 0 : i32
    return %c0_i32, %c0_i32_0 : i32, i32
  }
  func.func @transform_3(%arg0: i32) -> (i32, i32, i32) {
    %c0_i32 = arith.constant 0 : i32
    %c0_i32_0 = arith.constant 0 : i32
    %c0_i32_1 = arith.constant 0 : i32
    %c0_i32_2 = arith.constant 0 : i32
    return %c0_i32, %c0_i32_0, %c0_i32_1 : i32, i32, i32
  }
  func.func @transform_4(%arg0: i32) -> (i32, i32) {
    %c0_i32 = arith.constant 0 : i32
    %c0_i32_0 = arith.constant 0 : i32
    %c0_i32_1 = arith.constant 0 : i32
    return %c0_i32, %c0_i32_0 : i32, i32
  }
  func.func @transform_5(%arg0: i32) -> (i32, i32) {
    %c0_i32 = arith.constant 0 : i32
    %c0_i32_0 = arith.constant 0 : i32
    %c0_i32_1 = arith.constant 0 : i32
    return %c0_i32, %c0_i32_0 : i32, i32
  }
  func.func @transform_6(%arg0: i32) -> (i32, i32) {
    %c0_i32 = arith.constant 0 : i32
    %c0_i32_0 = arith.constant 0 : i32
    %c0_i32_1 = arith.constant 0 : i32
    return %c0_i32, %c0_i32_0 : i32, i32
  }
  func.func @transform_7(%arg0: i32) -> (i32, i32, i32) {
    %c0_i32 = arith.constant 0 : i32
    %c0_i32_0 = arith.constant 0 : i32
    %c0_i32_1 = arith.constant 0 : i32
    return %arg0, %c0_i32, %c0_i32_0 : i32, i32, i32
  }
}

</mosaic_0001>

<bundles_post_ra>
// kernel: tpu_custom_call.1
= control target key start
LH: loop header
LB: loop body
LE: loop exit
PB: predicated region body
PF: predicated region fallthrough
CT: control target
= control target key end

     0   :  { %12 = vsyncpa [#allocation5], 0  ;;  %s1197_s0 = inlined_call_operand.vmem [shape: bf16[2,4,16], index: 0, kind: input, shape index: {}]   ;;  %s1198_s1 = inlined_call_operand.vmem [shape: bf16[3,8,4], index: 1, kind: input, shape index: {}]   ;;  %s1199_s2 = inlined_call_operand.vmem [shape: f32[8,1], index: 2, kind: input, shape index: {}]   ;;  %s1200_s3 = inlined_call_operand.vmem [shape: bf16[3,8,8], index: 3, kind: input, shape index: {}]   ;;  %s1201_s4 = inlined_call_operand.vmem [shape: f32[8,1], index: 4, kind: input, shape index: {}]   ;;  %s1202_s5 = inlined_call_operand.vmem [shape: bf16[8,4], index: 5, kind: input, shape index: {}]   ;;  %s1203_s6 = inlined_call_operand.vmem [shape: f32[8,1], index: 6, kind: input, shape index: {}]   ;;  %s1204_s7 = inlined_call_operand.hbm [shape: f32[2,8,16], index: 7, kind: output, shape index: {}]  }
   0x1   :  { %14 = vsyncpa [#allocation5 + $0x1], 0  ;;  %s1017_s24 = smov 0   ;;  %s1019_s25 = smov 0  }
   0x2   :  { %s1021_s26 = smov 0   ;;  %s1023_s27 = smov 0  }
   0x3 LB: > { %s1038_s28 = sadd.s32 4294967295, %s967_s27   ;;  %s774_s29 = sadd.s32 4294967294, %s967_s27   ;;  %s967_s27 = sphi %s1023_s27, %s1210_s27   ;;  %s963_s26 = sphi %s1021_s26, %s1209_s26   ;;  %s959_s25 = sphi %s1019_s25, %s1208_s25   ;;  %s955_s24 = sphi %s1017_s24, %s1207_s24  }
   0x4   : > { %s1042_s30 = sadd.s32 1, %s967_s27   ;;  %s179_s8 = sadd.s32 1, %s963_s26 }
   0x5   : > { %s176_s9 = ssub.s32 %s967_s27, %s1042_s30  ;;  %p189_p0 = scmp.ne.s32.totalorder %s963_s26, %s959_s25 }
   0x6   : > { %p177_p1 = scmp.eq.s32.totalorder %s176_s9, 0  ;;  %p190_p2 = scmp.eq.s32.totalorder %s1038_s28, 1 }
   0x7   : > { %p195_p3 = scmp.ne.s32.totalorder %s959_s25, %s955_s24  ;;  %p196_p4 = scmp.eq.s32.totalorder %s774_s29, 1 }
   0x8   : > { %s1053_s10 = scalar_select %p177_p1, %s963_s26, %s179_s8  }
   0x9   : > { %p1055_p5 = por %p190_p2, %p189_p0  ;;  %p1059_p6 = por %p196_p4, %p195_p3 }
   0xa   : > { %p777_p7 = scmp.ge.s32.totalorder %s967_s27, 1  ;;  %p239_p8 = scmp.lt.s32.totalorder %s967_s27, 3 }
   0xc   : > { %p240_p9 = pnand %p777_p7, %p239_p8 }
   0xd   : > { %p270_p10 = scmp.lt.s32.totalorder (!%p240_p9), %s1038_s28, 1  ;;  %vm275_vm0 = vcmask (!%p240_p9), 25600   ;;  %v969_v0 = vmov (!%p240_p9), 0   ;;  %v970_v1 = vmov (!%p240_p9), 0.0   ;;  %s971_s18 = smov (!%p240_p9), 4   ;;  %v292_v5 = vlaneseq (!%p240_p9)  ;;  %v452_v15 = vld [vmem:[%s1199_s2] sm:$0xff] (!%p240_p9) }
   0xe   : > { %243 = sbr.rel (%p240_p9) target bundleno = 988 (0x3dc), region = 48  ;;  %276 = vst.msk [vmem:[#allocation2] sm:$0x3] (!%p240_p9), %vm275_vm0, %v969_v0  ;;  %820 = vmatprep.subr.bf16.mxu1 (!%p240_p9), %v970_v1  ;;  %814 = vmatprep.subr.bf16.mxu0 (!%p240_p9), %v970_v1  ;;  %v972_v3 = vmov (!%p240_p9), 1983009808   ;;  %vm282_vm1 = vcmask (!%p240_p9), 156704  }
   0xf   : > { %902 = vset.pattern.permute.xlu1 (!%p240_p9), %v969_v0  ;;  %903 = vset.pattern.permute.xlu0 (!%p240_p9), %v969_v0  ;;  %v290_v4 = vunpack.c.l.s4 (!%p240_p9), %v972_v3  ;;  %vm973_vm2 = vmmov (!%p240_p9), 0   ;;  %v293_v8 = vshrl.u32 (!%p240_p9), %v292_v5, 7  ;;  %vm302_vm3 = vcmask (!%p240_p9), 1041408   ;;  %s974_s19 = smov (!%p240_p9), 124   ;;  %v284_v14 = vld [vmem:[%s1198_s1] sm:$0xf] (!%p240_p9) }
  0x10   : > { %816 = vmatprep.mubr.msk.bf16.mxu0 (!%p240_p9), %vm973_vm2, %v970_v1  ;;  %822 = vmatprep.mubr.msk.bf16.mxu1 (!%p240_p9), %vm973_vm2, %v970_v1  ;;  %vm298_vm4 = vcmask (!%p240_p9), 31744   ;;  %s975_s29 = smov (!%p240_p9), 126   ;;  %v780_v19 = vld [vmem:[%s1198_s1 + $0x4] sm:$0xf] (!%p240_p9)  ;;  %v783_v21 = vld [vmem:[%s1198_s1 + $0x8] sm:$0xf] (!%p240_p9) }
  0x11   : > { %v291_v7 = vunpack.c.0.s8 (!%p240_p9), %v290_v4  ;;  %vm467_vm5 = vcmask (!%p240_p9), 158752   ;;  %vm469_vm6 = vcmask (!%p240_p9), 27648   ;;  %vm484_vm7 = vcmask (!%p240_p9), 1043456   ;;  %v471_v44 = vld [vmem:[%s1200_s3] sm:$0xf] (!%p240_p9)  ;;  %s796_s15 = sshll.u32 (!%p240_p9), %s1038_s28, 7 }
  0x12   : > { %vm480_vm8 = vcmask (!%p240_p9), 64512   ;;  %v635_v45 = vld [vmem:[%s1203_s6] sm:$0xff] (!%p240_p9)  ;;  %v791_v55 = vld [vmem:[%s1200_s3 + $0x8] sm:$0xf] (!%p240_p9)  ;;  %vm699_vm9 = vcmask (!%p240_p9), 130048   ;;  %s1155_s21 = scalar_lea.hbm (!%p240_p9), %s1204_s7, %s796_s15 }
  0x13   : > { %v294_v9 = vsub.s32 (!%p240_p9), %v291_v7, %v293_v8  ;;  %v625_v46 = vld [vmem:[%s1201_s4] sm:$0xff] (!%p240_p9) }
  0x14   : > { %v787_v50 = vld [vmem:[%s1200_s3 + $0x4] sm:$0xf] (!%p240_p9)  ;;  %v633_v54 = vld [vmem:[%s1202_s5] sm:$0xf] (!%p240_p9) }
  0x15   : > { %s271_s13 = scalar_select %p270_p10, %s1038_s28, 1 }
  0x16   : > { %s976_s28 = smov [#allocation4]  }
  0x17   : > { %s779_s14 = sshll.u32 %s271_s13, 1  ;;  %s267_s13 = sand.u32 1, %s959_s25  }
  0x18   : > { %s273_s17 = scalar_lea.vmem %s1197_s0, %s779_s14  ;;  %s778_s14 = sshll.u32 %s267_s13, 3 }
  0x19   : > { %v277_v2 = vld [vmem:[%s273_s17] sm:$0x3]  ;;  %s269_s16 = scalar_lea.vmem [#allocation4], %s778_s14  ;;  %s702_s22 = scalar_lea.sflag [#allocation5], %s267_s13 }
  0x1a   : > { %279 = vrot.lane.b32.xlu0 %v277_v2, %s971_s18  ;;  %s715_s17 = sshll.u32 %s269_s16, 4  ;;  %s1157_s17 = int_to_ptr.vmem [resolvable:$true] %s715_s17 }
  0x1b   : > { %s905_s23 = scalar_lea.vmem %s1157_s17, 128 }
  0x1c   : > { %p906_p11 = scmp.ne.s32.totalorder %s1157_s17, %s905_s23 }
  0x1e   : > { %p907_p12 = pnand %p906_p11, %p1055_p5 }
  0x20   : > { %p908_p13 = pneg %p907_p12 }
  0x8c   : > { %v280_v6 = vpop.permute.xlu0 %279 }
  0x8d   : > { %283 = vst.msk [vmem:[#allocation2] sm:$0x3] %vm282_vm1, %v280_v6 }
  0x94   : > { %v1080_v10 = vld.sshfl [vmem:[#allocation2] sm:$0x3 pattern:$0x76325410] }
  0x95   : > { %v285_v11 = vld [vmem:[#allocation2] sm:$0x3]  ;;  %403 = vrot.lane.b32.xlu1 %v1080_v10, %s974_s19 }
  0x96   : > { %v295_v12 = vrot.slane %v285_v11, %v294_v9  ;;  %v350_v13 = vsel %vm302_vm3, %v285_v11, 0 }
  0x97   : > { %821 = vmatpush3.bf16.msra.mxu1 %v350_v13 }
  0x98   : > { %296 = vrot.lane.b32.xlu0 %v295_v12, %s975_s29  ;;  %832 = vmatprep.subr.bf16.mxu1 %v970_v1 }
  0x99   : > { %455 = vperm.xlu1 %902, %v452_v15  }
  0x9a   : > { %823 = vmatmul.mubr.msk.bf16.vlgmr.msra.gmra.mrb[0].mxu1 %vm298_vm4, %v284_v14 }
  0x9b   : > { %834 = vmatprep.mubr.msk.bf16.mxu1 %vm973_vm2, %v970_v1 }
 0x107   : > { %v404_v18 = vpop.permute.xlu1 %403 }
 0x108   : > { %v409_v20 = vsel %vm302_vm3, %v404_v18, 0 }
 0x10a   : > { %v297_v16 = vpop.permute.xlu0 %296 }
 0x10b   : > { %v304_v17 = vsel %vm302_vm3, %v297_v16, 0 }
 0x10c   : > { %815 = vmatpush3.bf16.msra.mxu0 %v304_v17 }
 0x10d   : > { %826 = vmatprep.subr.bf16.mxu0 %v970_v1 }
 0x10f   : > { %817 = vmatmul.mubr.msk.bf16.vlgmr.msra.gmra.mrb[0].mxu0 %vm298_vm4, %v780_v19 }
 0x110   : > { %827 = vmatpush3.bf16.msra.mxu0 %v409_v20  ;;  %828 = vmatprep.mubr.msk.bf16.mxu0 %vm973_vm2, %v970_v1 }
 0x111   : > { %838 = vmatprep.subr.bf16.mxu0 %v970_v1 }
 0x117   : > { %829 = vmatmul.mubr.msk.bf16.vlgmr.msra.gmra.mrb[4].mxu0 %vm298_vm4, %v783_v21 }
 0x118   : > { %840 = vmatprep.mubr.msk.bf16.mxu0 %vm973_vm2, %v970_v1  ;;  %v456_v32 = vpop.permute.xlu1 %455 }
 0x16d   : > { %v386_v22 = vpop.f32.mrb[0].mxu1 }
 0x16e   : > { %v824_v23 = vpop.f32.mrb[1].mxu1 }
 0x16f   : > { %v389_v24 = vpop.f32.mrb[2].mxu1 }
 0x170   : > { %v825_v25 = vpop.f32.mrb[3].mxu1 }
 0x1e2   : > { %v340_v26 = vpop.f32.mrb[0].mxu0 }
 0x1e3   : > { %v387_v27 = vadd.f32 %v386_v22, %v340_v26  ;;  %v818_v28 = vpop.f32.mrb[1].mxu0 }
 0x1e4   : > { %v343_v29 = vpop.f32.mrb[2].mxu0 }
 0x1e5   : > { %v819_v30 = vpop.f32.mrb[3].mxu0 }
 0x1ea   : > { %v445_v31 = vpop.f32.mrb[4].mxu0 }
 0x1eb   : > { %v451_v33 = vadd.f32 %v445_v31, %v387_v27  ;;  %v830_v34 = vpop.f32.mrb[5].mxu0 }
 0x1ec   : > { %v448_v35 = vpop.f32.mrb[6].mxu0 }
 0x1ed   : > { %v458_v36 = vadd.f32 %v456_v32, %v451_v33  ;;  %v831_v37 = vpop.f32.mrb[7].mxu0 }
 0x1ef   : > { %v459_v38 = vmax.f32 %v458_v36, 0.0 }
 0x1f1   : > { %v799_v39 = vpack.c.bf16 %v459_v38, %v459_v38 }
 0x1f3   : > { %464 = vrot.lane.b32.xlu0 %v799_v39, %s971_s18 }
 0x265   : > { %v465_v40 = vpop.permute.xlu0 %464 }
 0x266   : > { %468 = vst.msk [vmem:[#allocation3] sm:$0xf] %vm467_vm5, %v465_v40 }
 0x267   : > { %470 = vst.msk [vmem:[#allocation3] sm:$0xf] %vm469_vm6, %v969_v0 }
 0x26e   : > { %v472_v41 = vld [vmem:[#allocation3] sm:$0xf] }
 0x26f   : > { %v788_v42 = vcombine.low %v472_v41, %v472_v41  ;;  %v532_v43 = vsel %vm484_vm7, %v472_v41, 0 }
 0x270   : > { %839 = vmatpush3.bf16.msra.mxu0 %v532_v43 }
 0x271   : > { %478 = vrot.lane.b32.xlu1 %v788_v42, %s975_s29  ;;  %576 = vrot.lane.b32.xlu0 %v788_v42, %s974_s19 }
 0x272   : > { %850 = vmatprep.subr.bf16.mxu0 %v970_v1 }
 0x273   : > { %841 = vmatmul.mubr.msk.bf16.vlgmr.msra.gmra.mrb[8].mxu0 %vm480_vm8, %v471_v44 }
 0x274   : > { %852 = vmatprep.mubr.msk.bf16.mxu0 %vm973_vm2, %v970_v1 }
 0x275   : > { %649 = vrot.lane.b32.xlu1 %v1080_v10, %s974_s19  ;;  %628 = vperm.xlu0 %903, %v625_v46   ;;  %s909_s19 = sshll.u32 %s976_s28, 4  ;;  %s910_s19 = int_to_ptr.vmem [resolvable:$false] %s909_s19 }
 0x276   : > { %s911_s29 = scalar_lea.vmem %s910_s19, 256  ;;  %p912_p0 = scmp.lt.s32.totalorder %s1157_s17, %s910_s19 }
 0x277   : > { %p913_p1 = scmp.lt.s32.totalorder %s911_s29, %s905_s23 }
 0x279   : > { %638 = vperm.xlu1 %902, %v635_v45   ;;  %p914_p2 = por %p913_p1, %p912_p0 }
 0x27b   : > { %p915_p3 = pnand %p914_p2, %p908_p13 }
 0x2e3   : > { %v479_v47 = vpop.permute.xlu1 %478  ;;  %v577_v48 = vpop.permute.xlu0 %576 }
 0x2e4   : > { %v486_v49 = vsel %vm484_vm7, %v479_v47, 0  ;;  %v582_v51 = vsel %vm484_vm7, %v577_v48, 0 }
 0x2e5   : > { %833 = vmatpush3.bf16.msra.mxu1 %v486_v49 }
 0x2e6   : > { %844 = vmatprep.subr.bf16.mxu1 %v970_v1 }
 0x2e7   : > { %v650_v52 = vpop.permute.xlu1 %649 }
 0x2e8   : > { %v655_v53 = vsel %vm302_vm3, %v650_v52, 0  ;;  %835 = vmatmul.mubr.msk.bf16.vlgmr.msra.gmra.mrb[4].mxu1 %vm480_vm8, %v787_v50 }
 0x2e9   : > { %851 = vmatpush3.bf16.msra.mxu0 %v655_v53  ;;  %845 = vmatpush3.bf16.msra.mxu1 %v582_v51 }
 0x2ea   : > { %846 = vmatprep.mubr.msk.bf16.mxu1 %vm973_vm2, %v970_v1 }
 0x2ec   : > { %853 = vmatmul.mubr.msk.bf16.vlgmr.msra.gmra.mrb[12].mxu0 %vm298_vm4, %v633_v54 }
 0x2f0   : > { %847 = vmatmul.mubr.msk.bf16.vlgmr.msra.gmra.mrb[8].mxu1 %vm480_vm8, %v791_v55 }
 0x2f4   : > { %v629_v6 = vpop.permute.xlu0 %628 }
 0x2f8   : > { %v639_v12 = vpop.permute.xlu1 %638 }
 0x346   : > { %v568_v56 = vpop.f32.mrb[8].mxu0 }
 0x347   : > { %v842_v57 = vpop.f32.mrb[9].mxu0 }
 0x348   : > { %v571_v58 = vpop.f32.mrb[10].mxu0 }
 0x349   : > { %v843_v59 = vpop.f32.mrb[11].mxu0 }
 0x3bb   : > { %v522_v60 = vpop.f32.mrb[4].mxu1 }
 0x3bc   : > { %v569_v61 = vadd.f32 %v568_v56, %v522_v60  ;;  %v836_v62 = vpop.f32.mrb[5].mxu1 }
 0x3bd   : > { %v525_v63 = vpop.f32.mrb[6].mxu1 }
 0x3be   : > { %v837_v0 = vpop.f32.mrb[7].mxu1 }
 0x3bf   : > { %v691_v2 = vpop.f32.mrb[12].mxu0 }
 0x3c0   : > { %v854_v1 = vpop.f32.mrb[13].mxu0  ;;  %v692_v13 = vadd.f32 %v691_v2, %v639_v12 }
 0x3c1   : > { %v694_v3 = vpop.f32.mrb[14].mxu0 }
 0x3c2   : > { %v855_v4 = vpop.f32.mrb[15].mxu0 }
 0x3c3   : > { %v618_v5 = vpop.f32.mrb[8].mxu1 }
 0x3c4   : > { %v624_v7 = vadd.f32 %v618_v5, %v569_v61  ;;  %v848_v8 = vpop.f32.mrb[9].mxu1 }
 0x3c5   : > { %v621_v9 = vpop.f32.mrb[10].mxu1 }
 0x3c6   : > { %v631_v10 = vadd.f32 %v629_v6, %v624_v7  ;;  %v849_v11 = vpop.f32.mrb[11].mxu1 }
 0x3c8   : > { %v632_v14 = vmax.f32 %v631_v10, 0.0 }
 0x3ca   : > { %v697_v15 = vadd.f32 %v692_v13, %v632_v14 }
 0x3cc   : > { %v698_v16 = vmax.f32 %v697_v15, 0.0 }
 0x3ce   : > { %700 = vst.msk [vmem:[%s269_s16] sm:$0xff] %vm699_vm9, %v698_v16 }
 0x3cf   : > { %918 = shalt.err (!%p915_p3)
}
 0x3d0   : > { %s919_s8 = scalar_lea.hbm %s1155_s21, 128  ;;  %s923_s14 = scalar_lea.hbm %s1204_s7, 256 }
 0x3d1   : > { %p920_p4 = scmp.ne.s32.totalorder %s1155_s21, %s919_s8  ;;  %p924_p9 = scmp.lt.u32.totalorder %s1155_s21, %s1204_s7 }
 0x3d2   : > { %p925_p10 = scmp.lt.u32.totalorder %s923_s14, %s919_s8  ;;  %p927_p12 = scmp.lt.u32.totalorder %s919_s8, %s1155_s21 }
 0x3d3   : > { %p921_p7 = pnand %p920_p4, %p1055_p5 }
 0x3d4   : > { %p926_p11 = por %p925_p10, %p924_p9 }
 0x3d5   : > { %p922_p8 = pneg %p921_p7 }
 0x3d6   : > { %p928_p13 = por %p927_p12, %p926_p11 }
 0x3d8   : > { %p929_p0 = pnand %p928_p13, %p922_p8 }
 0x3da   : > { %932 = shalt.err (!%p929_p0)
}
 0x3db   : > { %856 = dma.vmem_to_hbm [thread:$0]  (%p1055_p5), %s1157_s17, 128, %s1155_s21, %s702_s22  }
 0x3dc PF: > { %p862_p1 = scmp.ge.s32.totalorder %s967_s27, 2  ;;  %s727_s18 = sand.u32 1, %s955_s24  }
 0x3dd   : > { %s728_s20 = scalar_lea.sflag [#allocation5], %s727_s18 }
 0x3de   : > { %p859_p2 = pnand %p862_p1, %p1059_p6 }
 0x3e0   : > { %950 = dma.done.wait (!%p859_p2), %s728_s20, 128  }
 0x3e1   : > { %952 = vsyncadd (!%p859_p2), %s728_s20, 4294967168  ;;  %p17_p3 = scmp.ge.s32.totalorder %s1042_s30, 4   ;;  %s1207_s24 = smov %s959_s25 }
 0x3e2   : > { %s1208_s25 = smov %s963_s26  ;;  %s1209_s26 = smov %s1053_s10 }
 0x3e3   : > { %s1210_s27 = smov %s1042_s30  ;;  %19 = sbr.rel (!%p17_p3) target bundleno = 3 (0x3), region = 87 }
 0x3ea   :  { %733 = vsyncpa [#allocation5], 1 }
 0x3eb   :  { %735 = vsyncpa [#allocation5 + $0x1], 1 }

</bundles_post_ra>
